<compile_context>
chip_gen: v6e
topology: v6e:2x2x1
jax: 0.10.0
libtpu: 0.0.40
codegen_flags: <defaults>
</compile_context>

<pallas_src>
import functools

import jax
import jax.numpy as jnp
from jax.experimental import pallas as pl
from jax.experimental.pallas import tpu as pltpu


# ----------------------------------------------------------------------------
# Deterministic (unused-by-forward) parameter initialization, honoring the
# module constructor's shapes (Unet1D init conv: channels=1 -> n_unet_dim,
# kernel size 7; diffusion beta schedule of length n_timesteps).
# ----------------------------------------------------------------------------
def init_ldm_params(n_dim=64, n_latent_dim=16, n_timesteps=10,
                    n_unet_dim=32, n_resnet_block_groups=4):
    key = jax.random.PRNGKey(0)
    k0, _ = jax.random.split(key)
    params = {
        "unet_init_conv_w": jax.random.normal(k0, (n_unet_dim, 1, 7), jnp.float32) * 0.02,
        "unet_init_conv_b": jnp.zeros((n_unet_dim,), jnp.float32),
        "betas": jnp.linspace(1e-4, 2e-2, n_timesteps, dtype=jnp.float32),
    }
    hparams = dict(n_dim=n_dim, n_latent_dim=n_latent_dim,
                   n_timesteps=n_timesteps, n_unet_dim=n_unet_dim,
                   n_resnet_block_groups=n_resnet_block_groups)
    return params, hparams


# ----------------------------------------------------------------------------
# Pallas identity / streaming-copy kernel (only used when a copy is requested;
# the default forward path performs zero data movement).
# ----------------------------------------------------------------------------
_LANE = 128
# 2048 rows x 128 lanes x 4 B = 1 MiB per f32 tile; double-buffered input +
# output = ~4 MiB of VMEM, comfortably inside every generation's scoped limit
# while keeping per-grid-step overhead (~0.35 us) negligible vs. DMA time.
_MAX_TILE_ROWS = 2048


def _sublane_multiple(dtype):
    """Minimum second-minor tile multiple: 8 for f32, 16 for bf16, 32 for i8."""
    itemsize = jnp.dtype(dtype).itemsize
    return max(8, 32 // max(itemsize, 1))


def _copy_kernel(x_ref, o_ref):
    o_ref[...] = x_ref[...]


@functools.partial(jax.jit, static_argnames=("max_tile_rows",))
def pallas_identity(x, *, max_tile_rows=_MAX_TILE_ROWS):
    """Identity copy of `x` through a lane-dense Pallas streaming kernel."""
    orig_shape = x.shape
    n = x.size

    # Lane-dense view: flatten and pad the flat length up to a multiple of 128
    # so the output's last dim is always 128 (full-width, unmasked stores).
    pad = (-n) % _LANE
    flat = x.reshape(-1)
    if pad:
        flat = jnp.pad(flat, (0, pad))
    rows = (n + pad) // _LANE
    x2 = flat.reshape(rows, _LANE)

    sub = _sublane_multiple(x.dtype)
    if rows <= max_tile_rows:
        # Single block equal to the full array dims: always legal, grid=(1,).
        tile_rows = rows
    else:
        # Fixed tile size (multiple of the dtype's sublane packing); Pallas
        # handles the ragged last block via cdiv — no divisor search.
        tile_rows = max_tile_rows - (max_tile_rows % sub)

    grid = (pl.cdiv(rows, tile_rows),)

    out2 = pl.pallas_call(
        _copy_kernel,
        out_shape=jax.ShapeDtypeStruct((rows, _LANE), x.dtype),
        grid=grid,
        in_specs=[pl.BlockSpec((tile_rows, _LANE), lambda i: (i, 0))],
        out_specs=pl.BlockSpec((tile_rows, _LANE), lambda i: (i, 0)),
        compiler_params=pltpu.CompilerParams(
            # Lets v7x's two TensorCores split a multi-step grid; harmless
            # no-op on single-TC v5e/v6e or for a 1-step grid.
            dimension_semantics=("parallel",),
            # Explicit limit keeps the 1 MiB tile portable (v5e default is
            # only 16 MiB scoped VMEM).
            vmem_limit_bytes=32 << 20),
    )(x2)

    out_flat = out2.reshape(-1)
    if pad:
        out_flat = out_flat[:n]
    return out_flat.reshape(orig_shape)


# ----------------------------------------------------------------------------
# Forward wrapper — matches PyTorch's `return [inputs]` semantics.
# ----------------------------------------------------------------------------
def ldm_forward(params, inputs, *, force_pallas=False):
    """LDM.forward: returns [inputs].

    By default this performs zero data movement (the identity's optimal cost).
    Set force_pallas=True to route through the Pallas streaming-copy kernel
    (e.g. to validate the kernel or to materialize a fresh buffer).
    """
    del params  # forward() does not use the diffusion parameters.
    if force_pallas:
        return [pallas_identity(inputs)]
    return [inputs]


if __name__ == "__main__":
    # Small shapes consistent with the module: inputs are (batch, n_dim).
    n_dim = 64
    batch = 16

    params, hparams = init_ldm_params(n_dim=n_dim)

    key = jax.random.PRNGKey(0)
    x = jax.random.normal(key, (batch, n_dim), dtype=jnp.float32)

    # 1) Default forward path: zero-cost identity, list-wrapped.
    result = ldm_forward(params, x)
    assert isinstance(result, list) and len(result) == 1
    assert result[0].shape == x.shape and result[0].dtype == x.dtype

    # 2) Exercise the Pallas kernel once on TPU (lane-dense path: 16*64=1024
    #    elements -> (8, 128) single block).
    result_pl = ldm_forward(params, x, force_pallas=True)
    out = result_pl[0]
    jax.block_until_ready(out)
    assert out.shape == x.shape and out.dtype == x.dtype
    assert bool(jnp.all(out == x))

    # 3) Also exercise the padded (non-multiple-of-128) path once.
    y = jax.random.normal(jax.random.PRNGKey(1), (5, 33), dtype=jnp.float32)
    out_y = pallas_identity(y)
    jax.block_until_ready(out_y)
    assert out_y.shape == y.shape
    assert bool(jnp.all(out_y == y))

    print("KERNEL_OK")
</pallas_src>

<mosaic_0001>
module attributes {stable_mosaic.version = 11 : i64} {
  func.func @_copy_kernel(%arg0: i32, %arg1: memref<8x128xf32, #tpu.memory_space<vmem>>, %arg2: memref<8x128xf32, #tpu.memory_space<vmem>>) attributes {dimension_semantics = [#tpu.dimension_semantics<parallel>], iteration_bounds = array<i64: 1>, scalar_prefetch = 0 : i64, scratch_operands = 0 : i64, tpu.core_type = #tpu.core_type<tc>, window_params = [{transform_indices = @transform_0, window_bounds = array<i64: 8, 128>}, {transform_indices = @transform_1, window_bounds = array<i64: 8, 128>}]} {
    %c0 = arith.constant 0 : index
    %c0_0 = arith.constant 0 : index
    %0 = vector.load %arg1[%c0, %c0_0] : memref<8x128xf32, #tpu.memory_space<vmem>>, vector<8x128xf32>
    %c0_1 = arith.constant 0 : index
    %c0_2 = arith.constant 0 : index
    %1 = vector.load %arg2[%c0_1, %c0_2] : memref<8x128xf32, #tpu.memory_space<vmem>>, vector<8x128xf32>
    tpu.vector_store %arg2[%c0_1, %c0_2], %0 {strides = array<i32>} : memref<8x128xf32, #tpu.memory_space<vmem>>, vector<8x128xf32>,
    return
  }
  func.func @transform_0(%arg0: i32) -> (i32, i32) {
    %c0_i32 = arith.constant 0 : i32
    %c0_i32_0 = arith.constant 0 : i32
    return %arg0, %c0_i32 : i32, i32
  }
  func.func @transform_1(%arg0: i32) -> (i32, i32) {
    %c0_i32 = arith.constant 0 : i32
    %c0_i32_0 = arith.constant 0 : i32
    return %arg0, %c0_i32 : i32, i32
  }
}

</mosaic_0001>

<bundles_post_ra>
// kernel: pallas_identity.1
= control target key start
LH: loop header
LB: loop body
LE: loop exit
PB: predicated region body
PF: predicated region fallthrough
CT: control target
= control target key end

     0   :  { %s30_s0 = inlined_call_operand.vmem [shape: f32[8,128], index: 0, kind: input, shape index: {}]   ;;  %s31_s1 = inlined_call_operand.vmem [shape: f32[8,128], index: 1, kind: output, shape index: {}]  }
   0x1   :  { %v8_v0 = vld [vmem:[%s30_s0] sm:$0xff] }
   0x2   :  { %9 = vst [vmem:[%s31_s1] sm:$0xff] %v8_v0 }

</bundles_post_ra>
